<compile_context>
chip_gen: v6e
topology: v6e:2x2x1
jax: 0.10.0
libtpu: 0.0.40
codegen_flags: <defaults>
</compile_context>

<pallas_src>
from itertools import combinations

import numpy as np
import jax
import jax.numpy as jnp
from jax.experimental import pallas as pl
from jax.experimental.pallas import tpu as pltpu


def _round_up(x, m):
    return ((x + m - 1) // m) * m


def _trunk_defaults():
    """Generation-aware (row tile, vmem limit) for the FFN trunk."""
    try:
        vmem = pltpu.get_tpu_info().vmem_capacity_bytes
    except Exception:
        vmem = 64 << 20
    if vmem >= (96 << 20):          # v5e / v6e: 128 MiB physical VMEM
        return 1024, 96 << 20
    return 512, 48 << 20            # v7x: 64 MiB physical VMEM per TC


# ----------------------------------------------------------------------------
# Kernel 1: encoder trunk stand-in (gathered token embeds -> contextual embeds)
# ----------------------------------------------------------------------------
def _ffn_kernel(x_ref, w1_ref, b1_ref, w2_ref, b2_ref, o_ref):
    # bf16 MXU operands, f32 accumulation / bias / GELU.
    h = jnp.dot(x_ref[...], w1_ref[...],
                preferred_element_type=jnp.float32)                  # (TM, F)
    # TODO(synk): tanh-approx GELU (PyTorch nn.GELU default is exact erf).
    h = jax.nn.gelu(h + b1_ref[...], approximate=True)
    y = jnp.dot(h.astype(jnp.bfloat16), w2_ref[...],
                preferred_element_type=jnp.float32)                  # (TM, H)
    o_ref[...] = (y + b2_ref[...]).astype(o_ref.dtype)               # bf16 out


def ffn_forward(x, w1, b1, w2, b2, *, tm=None, vmem_limit_bytes=None):
    n, hdim = x.shape
    f = w1.shape[1]

    d_tm, d_vmem = _trunk_defaults()
    tm = tm or d_tm
    vmem_limit_bytes = vmem_limit_bytes or d_vmem

    # bf16 input tile: row tile must be a multiple of 16 (sublane packing).
    n16 = _round_up(n, 16)
    tm = min(tm, n16)
    if n16 // tm < 2 and n16 >= 32:
        tm = _round_up(n16 // 2, 16)      # >=2 grid steps -> both v7x TCs busy
    n_pad = _round_up(n, tm)

    if x.dtype != jnp.bfloat16:
        x = x.astype(jnp.bfloat16)
    if n_pad != n:
        x = jnp.pad(x, ((0, n_pad - n), (0, 0)))
    w1 = w1 if w1.dtype == jnp.bfloat16 else w1.astype(jnp.bfloat16)
    w2 = w2 if w2.dtype == jnp.bfloat16 else w2.astype(jnp.bfloat16)

    def _call(single_buffer_weights):
        resident = ({"pipeline_mode": pl.Buffered(1)}
                    if single_buffer_weights else {})
        return pl.pallas_call(
            _ffn_kernel,
            out_shape=jax.ShapeDtypeStruct((n_pad, hdim), jnp.bfloat16),
            grid=(n_pad // tm,),
            in_specs=[
                pl.BlockSpec((tm, hdim), lambda i: (i, 0)),           # streamed
                pl.BlockSpec((hdim, f), lambda i: (0, 0), **resident),  # resident
                pl.BlockSpec((1, f), lambda i: (0, 0), **resident),
                pl.BlockSpec((f, hdim), lambda i: (0, 0), **resident),
                pl.BlockSpec((1, hdim), lambda i: (0, 0), **resident),
            ],
            out_specs=pl.BlockSpec((tm, hdim), lambda i: (i, 0)),
            compiler_params=pltpu.CompilerParams(
                dimension_semantics=("parallel",),
                vmem_limit_bytes=vmem_limit_bytes),
        )(x, w1, b1, w2, b2)

    try:
        out = _call(True)     # single-buffered resident weights (halves VMEM)
    except Exception:
        # TODO(synk): pl.Buffered(1) not accepted by this JAX build; fall back
        # to default (double-buffered) resident weights.
        out = _call(False)
    return out[:n]


# ----------------------------------------------------------------------------
# Kernel 2: SumEncoder head -> lane-dense sent_scores + masked BCE loss
# ----------------------------------------------------------------------------
def _softplus(x):
    # Stable softplus from ops guaranteed to lower on Mosaic (exp/log/abs/max).
    return jnp.maximum(x, 0.0) + jnp.log(1.0 + jnp.exp(-jnp.abs(x)))


def _head_kernel(xT_ref, w_ref, b_ref, mask_ref, y_ref, score_ref, loss_ref):
    # logits via MXU dot: (1,H)@(H,Np) bf16 -> f32
    logits = jnp.dot(w_ref[...], xT_ref[...],
                     preferred_element_type=jnp.float32) + b_ref[...]  # (1, Np)
    mask = mask_ref[...]                                               # (1, Np)
    scores = jax.nn.sigmoid(logits) * mask                             # sigmoid * cls_mask
    score_ref[...] = scores

    y = y_ref[...]                                                     # (1, Np)
    # nn.BCELoss(sigmoid(logits), y) computed from logits (log-sigmoid form);
    # PyTorch clamps each log term at -100 -> clamp softplus at 100.
    bce = (y * jnp.minimum(_softplus(-logits), 100.0)
           + (1.0 - y) * jnp.minimum(_softplus(logits), 100.0))
    num = jnp.sum(bce * mask, keepdims=True)                           # (1, 1)
    den = jnp.sum(mask, keepdims=True)                                 # num_sents.sum()
    loss_ref[...] = num / jnp.maximum(den, 1.0)


def head_forward(cls_embeds, w, b, mask, labels, *, vmem_limit_bytes=32 << 20):
    # TODO(synk): for very long docs, tile the head over Np with partial sums.
    B, M, H = cls_embeds.shape
    n = B * M
    n_pad = _round_up(n, 128)                                          # lane-dense scores
    xT = jnp.pad(cls_embeds.reshape(n, H).T, ((0, 0), (0, n_pad - n)))  # bf16 (H, Np)
    mask2 = jnp.pad(mask.reshape(1, n), ((0, 0), (0, n_pad - n)))
    y2 = jnp.pad(labels.reshape(1, n), ((0, 0), (0, n_pad - n)))

    scores, loss = pl.pallas_call(
        _head_kernel,
        out_shape=(
            jax.ShapeDtypeStruct((1, n_pad), jnp.float32),
            jax.ShapeDtypeStruct((1, 1), jnp.float32),
        ),
        grid=(1,),
        in_specs=[
            pl.BlockSpec((H, n_pad), lambda i: (0, 0)),
            pl.BlockSpec((1, H), lambda i: (0, 0)),
            pl.BlockSpec((1, 1), lambda i: (0, 0)),
            pl.BlockSpec((1, n_pad), lambda i: (0, 0)),
            pl.BlockSpec((1, n_pad), lambda i: (0, 0)),
        ],
        out_specs=(
            pl.BlockSpec((1, n_pad), lambda i: (0, 0)),
            pl.BlockSpec((1, 1), lambda i: (0, 0)),
        ),
        compiler_params=pltpu.CompilerParams(
            vmem_limit_bytes=vmem_limit_bytes),
    )(xT, w, b, mask2, y2)
    return scores[0, :n].reshape(B, M), loss


# ----------------------------------------------------------------------------
# Kernel 3: batched candidate mean-embeddings + cosine similarity + fused
#           candidate margin-ranking loss (single call over the whole batch)
# ----------------------------------------------------------------------------
NUM_EXT_SENT = 5
NUM_CAN_SENT = (2, 3)
MARGIN = 0.01
ALPHA = 1.0
BETA = 1.0


def _cossim_kernel(clsT_ref, selT_ref, docT_ref, cnt_ref, sim_ref, loss_ref):
    clsT = clsT_ref[...]                                   # (B, H, M) bf16
    selT = selT_ref[...]                                   # (B, M, Cp) bf16
    docT = docT_ref[...].astype(jnp.float32)               # (B, H, 1)
    # candidate mean-embeddings (transposed): batched bf16 MXU matmul, f32 acc
    canT = jnp.einsum("bhm,bmc->bhc", clsT, selT,
                      preferred_element_type=jnp.float32)  # (B, H, Cp)
    dots = jnp.sum(canT * docT, axis=1)                    # (B, Cp)
    can_sq = jnp.sum(canT * canT, axis=1)                  # (B, Cp)
    doc_sq = jnp.sum(docT * docT, axis=1)                  # (B, 1)
    eps = jnp.float32(1e-8)                                # torch.cosine_similarity eps
    denom = jnp.maximum(jnp.sqrt(can_sq), eps) * jnp.maximum(jnp.sqrt(doc_sq), eps)
    sim = dots / denom                                     # exact divide (ranking-sensitive)
    sim_ref[...] = sim

    # Fused candidate loss:  sum_i sum_{d>0} mean_k max(0, -(s_k - s_{k+d}) + margin*d)
    cnt = cnt_ref[...]                                     # (B, 1) valid-candidate counts
    b_dim, cp = sim.shape
    col = jax.lax.broadcasted_iota(jnp.int32, (cp, cp), 1).astype(jnp.float32)
    row = jax.lax.broadcasted_iota(jnp.int32, (cp, cp), 0).astype(jnp.float32)
    d = col - row                                          # shift j - i
    hinge = jnp.maximum(0.0, -(sim[:, :, None] - sim[:, None, :]) + MARGIN * d[None])
    valid = jnp.logical_and(d[None] > 0.0, col[None] < cnt[:, :, None])
    pair_w = jnp.where(valid,
                       1.0 / jnp.maximum(cnt[:, :, None] - d[None], 1.0), 0.0)
    per_row = jnp.sum(hinge * pair_w, axis=2)              # (B, Cp) lane reduction
    loss_ref[...] = jnp.sum(per_row, keepdims=True) / jnp.float32(b_dim)


def cossim_forward(cls_T, sel_T, doc_T, counts, *, vmem_limit_bytes=32 << 20):
    B, H, M = cls_T.shape
    C = sel_T.shape[-1]
    sim, loss = pl.pallas_call(
        _cossim_kernel,
        out_shape=(
            jax.ShapeDtypeStruct((B, C), jnp.float32),
            jax.ShapeDtypeStruct((1, 1), jnp.float32),
        ),
        grid=(1,),
        in_specs=[
            pl.BlockSpec((B, H, M), lambda i: (0, 0, 0)),
            pl.BlockSpec((B, M, C), lambda i: (0, 0, 0)),
            pl.BlockSpec((B, H, 1), lambda i: (0, 0, 0)),
            pl.BlockSpec((B, 1), lambda i: (0, 0)),
        ],
        out_specs=(
            pl.BlockSpec((B, C), lambda i: (0, 0)),
            pl.BlockSpec((1, 1), lambda i: (0, 0)),
        ),
        compiler_params=pltpu.CompilerParams(
            vmem_limit_bytes=vmem_limit_bytes),
    )(cls_T, sel_T, doc_T, counts)
    return sim, loss


# ----------------------------------------------------------------------------
# Host-side glue mirroring CoLo_BART.match / candidate_loss / forward
# ----------------------------------------------------------------------------
def _enumerate_candidates(sent_scores_np, num_sents_np, M, c_pad):
    """Candidate id lists + (B, M, C_PAD) mean-selection tensor + counts."""
    B = sent_scores_np.shape[0]
    sel_T = np.zeros((B, M, c_pad), dtype=np.float32)
    counts = np.zeros((B, 1), dtype=np.float32)
    can_sum_ids_all = []
    for i in range(B):
        top = np.argsort(-sent_scores_np[i], kind="stable")[:NUM_EXT_SENT]
        can_sent_ids = [int(j) for j in top if int(j) < int(num_sents_np[i])]
        if len(can_sent_ids) < min(NUM_CAN_SENT):
            can_sum_ids = list(combinations(can_sent_ids, len(can_sent_ids)))
        else:
            can_sum_ids = sum(
                [list(combinations(can_sent_ids, k)) for k in sorted(NUM_CAN_SENT)], [])
        for r, ids in enumerate(can_sum_ids):
            for j in ids:
                sel_T[i, j, r] = 1.0 / float(len(ids))
        counts[i, 0] = float(len(can_sum_ids))
        can_sum_ids_all.append(can_sum_ids)
    return can_sum_ids_all, sel_T, counts


def colo_bart_forward(params, input_ids, cls_token_ids, ext_labels):
    B, S = input_ids.shape
    _, M = cls_token_ids.shape
    H = params["emb"].shape[1]

    # Only token 0 (doc embedding) and the CLS positions are consumed
    # downstream, and the FFN trunk stand-in is row-wise -> gather those
    # B*(M+1) rows BEFORE the trunk instead of running it over all B*S tokens.
    # TODO(synk): with a real BART encoder (full self-attention) this shortcut
    # is invalid; the CLS gather would instead be fused into the trunk
    # epilogue via scalar-prefetched cls_token_ids.
    cls_mask = (cls_token_ids >= 0).astype(jnp.float32)               # (B, M)
    safe_ids = jnp.clip(cls_token_ids, 0, S - 1)
    gather_pos = jnp.concatenate(
        [jnp.zeros((B, 1), jnp.int32), safe_ids], axis=1)             # (B, M+1)
    sel_tokens = jnp.take_along_axis(input_ids, gather_pos, axis=1)   # (B, M+1)
    x = params["emb"][sel_tokens.reshape(-1)]                         # (B*(M+1), H) bf16

    embeds = ffn_forward(x, params["w1"], params["b1"],
                         params["w2"], params["b2"]).reshape(B, M + 1, H)
    doc_embeds = embeds[:, 0, :]                                      # (B, H)    bf16
    cls_embeds = embeds[:, 1:, :]                                     # (B, M, H) bf16

    labels = ext_labels.astype(jnp.float32) * cls_mask
    sent_scores, sent_loss = head_forward(
        cls_embeds, params["head_w"], params["head_b"], cls_mask, labels)
    num_sents = jnp.sum(cls_mask, axis=-1)

    # Host sync #1 (unavoidable): candidate enumeration is data-dependent
    # combinatorics producing Python-list outputs.
    scores_np, num_sents_np = jax.device_get((sent_scores, num_sents))
    scores_np, num_sents_np = np.asarray(scores_np), np.asarray(num_sents_np)

    c_max = sum(len(list(combinations(range(NUM_EXT_SENT), k))) for k in NUM_CAN_SENT)
    c_pad = _round_up(max(c_max, 1), 128)                             # lane-dense sim slab
    can_sum_ids_all, sel_T, counts = _enumerate_candidates(
        scores_np, num_sents_np, M, c_pad)

    # One fixed-shape batched cossim + fused candidate-loss call (bf16 MXU).
    cls_T = jnp.transpose(cls_embeds, (0, 2, 1))                      # (B, H, M) bf16
    doc_T = doc_embeds[:, :, None]                                    # (B, H, 1) bf16
    sim_all, sum_loss = cossim_forward(
        cls_T, jnp.asarray(sel_T, dtype=jnp.bfloat16), doc_T,
        jnp.asarray(counts, dtype=jnp.float32))

    sum_loss = sum_loss[0, 0]
    total_loss = ALPHA * sent_loss[0, 0] + BETA * sum_loss

    # Host sync #2: prediction / confidence ordering (Python-list output).
    sim_np = np.asarray(jax.device_get(sim_all))
    prediction, confidence = [], []
    for i in range(B):
        c = len(can_sum_ids_all[i])
        s = sim_np[i, :c]
        order = np.argsort(-s, kind="stable")
        prediction.append([can_sum_ids_all[i][j] for j in order])
        confidence.append(jnp.asarray(s[order]))

    return {
        "loss": total_loss,
        "prediction": prediction,
        "confidence": confidence,
        "sentence_loss": sent_loss[0, 0],
        "summary_loss": sum_loss,
    }


# ----------------------------------------------------------------------------
if __name__ == "__main__":
    B, S, H, F, V, M = 2, 16, 128, 256, 64, 8

    key = jax.random.PRNGKey(0)
    ks = jax.random.split(key, 8)
    # Weights/embeddings stored in bf16 (no per-call wrapper casts).
    params = {
        "emb": (0.02 * jax.random.normal(ks[0], (V, H), jnp.float32)).astype(jnp.bfloat16),
        "w1": (0.02 * jax.random.normal(ks[1], (H, F), jnp.float32)).astype(jnp.bfloat16),
        "b1": jnp.zeros((1, F), jnp.float32),
        "w2": (0.02 * jax.random.normal(ks[2], (F, H), jnp.float32)).astype(jnp.bfloat16),
        "b2": jnp.zeros((1, H), jnp.float32),
        "head_w": (0.02 * jax.random.normal(ks[3], (1, H), jnp.float32)).astype(jnp.bfloat16),
        "head_b": jnp.zeros((1, 1), jnp.float32),
    }

    input_ids = jax.random.randint(ks[4], (B, S), 0, V, dtype=jnp.int32)
    # left-aligned CLS token positions, -1 = padded sentence slot
    cls_token_ids = jnp.array(
        [[0, 2, 5, 7, 9, 11, -1, -1],
         [0, 2, 4, 6, 8, 10, 12, 14]], dtype=jnp.int32)
    ext_labels = jax.random.bernoulli(ks[5], 0.4, (B, M)).astype(jnp.int32)

    out = colo_bart_forward(params, input_ids, cls_token_ids, ext_labels)

    jax.block_until_ready(out["loss"])
    for c in out["confidence"]:
        jax.block_until_ready(c)

    assert np.isfinite(float(out["loss"]))
    assert len(out["prediction"]) == B
    print("KERNEL_OK")
</pallas_src>

<mosaic_0001>
module attributes {stable_mosaic.version = 11 : i64} {
  func.func @_ffn_kernel(%arg0: i32, %arg1: memref<16x128xbf16, #tpu.memory_space<vmem>>, %arg2: memref<128x256xbf16, #tpu.memory_space<vmem>>, %arg3: memref<1x256xf32, #tpu.memory_space<vmem>>, %arg4: memref<256x128xbf16, #tpu.memory_space<vmem>>, %arg5: memref<1x128xf32, #tpu.memory_space<vmem>>, %arg6: memref<16x128xbf16, #tpu.memory_space<vmem>>) attributes {dimension_semantics = [#tpu.dimension_semantics<parallel>], iteration_bounds = array<i64: 2>, scalar_prefetch = 0 : i64, scratch_operands = 0 : i64, tpu.core_type = #tpu.core_type<tc>, window_params = [{transform_indices = @transform_0, window_bounds = array<i64: 16, 128>}, {pipeline_mode = #tpu.pipeline_mode<synchronous>, transform_indices = @transform_1, window_bounds = array<i64: 128, 256>}, {pipeline_mode = #tpu.pipeline_mode<synchronous>, transform_indices = @transform_2, window_bounds = array<i64: 1, 256>}, {pipeline_mode = #tpu.pipeline_mode<synchronous>, transform_indices = @transform_3, window_bounds = array<i64: 256, 128>}, {pipeline_mode = #tpu.pipeline_mode<synchronous>, transform_indices = @transform_4, window_bounds = array<i64: 1, 128>}, {transform_indices = @transform_5, window_bounds = array<i64: 16, 128>}]} {
    %c0 = arith.constant 0 : index
    %c0_0 = arith.constant 0 : index
    %0 = vector.load %arg1[%c0, %c0_0] : memref<16x128xbf16, #tpu.memory_space<vmem>>, vector<16x128xbf16>
    %c0_1 = arith.constant 0 : index
    %c0_2 = arith.constant 0 : index
    %1 = vector.load %arg2[%c0_1, %c0_2] : memref<128x256xbf16, #tpu.memory_space<vmem>>, vector<128x256xbf16>
    %cst = arith.constant dense<0.000000e+00> : vector<16x256xf32>
    %2 = tpu.matmul %0, %1, %cst {dimension_numbers = #tpu.dot_dimension_numbers<[1], [0], [0], [1], [0, 0, 1, 1], [], []>} : vector<16x128xbf16>, vector<128x256xbf16>, vector<16x256xf32> -> vector<16x256xf32>
    %c0_3 = arith.constant 0 : index
    %c0_4 = arith.constant 0 : index
    %3 = vector.load %arg3[%c0_3, %c0_4] : memref<1x256xf32, #tpu.memory_space<vmem>>, vector<1x256xf32>
    %4 = vector.broadcast %3 : vector<1x256xf32> to vector<16x256xf32>
    %5 = arith.addf %2, %4 : vector<16x256xf32>
    %6 = arith.mulf %5, %5 : vector<16x256xf32>
    %7 = arith.mulf %5, %6 : vector<16x256xf32>
    %cst_5 = arith.constant 4.471500e-02 : f32
    %8 = vector.broadcast %cst_5 : f32 to vector<16x256xf32>
    %9 = arith.mulf %8, %7 : vector<16x256xf32>
    %10 = arith.addf %5, %9 : vector<16x256xf32>
    %cst_6 = arith.constant 0.797884583 : f32
    %11 = vector.broadcast %cst_6 : f32 to vector<16x256xf32>
    %12 = arith.mulf %11, %10 : vector<16x256xf32>
    %13 = math.tanh %12 : vector<16x256xf32>
    %cst_7 = arith.constant 1.000000e+00 : f32
    %14 = vector.broadcast %cst_7 : f32 to vector<16x256xf32>
    %15 = arith.addf %14, %13 : vector<16x256xf32>
    %cst_8 = arith.constant 5.000000e-01 : f32
    %16 = vector.broadcast %cst_8 : f32 to vector<16x256xf32>
    %17 = arith.mulf %16, %15 : vector<16x256xf32>
    %18 = arith.mulf %5, %17 : vector<16x256xf32>
    %19 = arith.truncf %18 : vector<16x256xf32> to vector<16x256xbf16>
    %c0_9 = arith.constant 0 : index
    %c0_10 = arith.constant 0 : index
    %20 = vector.load %arg4[%c0_9, %c0_10] : memref<256x128xbf16, #tpu.memory_space<vmem>>, vector<256x128xbf16>
    %cst_11 = arith.constant dense<0.000000e+00> : vector<16x128xf32>
    %21 = tpu.matmul %19, %20, %cst_11 {dimension_numbers = #tpu.dot_dimension_numbers<[1], [0], [0], [1], [0, 0, 1, 1], [], []>} : vector<16x256xbf16>, vector<256x128xbf16>, vector<16x128xf32> -> vector<16x128xf32>
    %c0_12 = arith.constant 0 : index
    %c0_13 = arith.constant 0 : index
    %22 = vector.load %arg5[%c0_12, %c0_13] : memref<1x128xf32, #tpu.memory_space<vmem>>, vector<1x128xf32>
    %23 = vector.broadcast %22 : vector<1x128xf32> to vector<16x128xf32>
    %24 = arith.addf %21, %23 : vector<16x128xf32>
    %25 = arith.truncf %24 : vector<16x128xf32> to vector<16x128xbf16>
    %c0_14 = arith.constant 0 : index
    %c0_15 = arith.constant 0 : index
    %26 = vector.load %arg6[%c0_14, %c0_15] : memref<16x128xbf16, #tpu.memory_space<vmem>>, vector<16x128xbf16>
    tpu.vector_store %arg6[%c0_14, %c0_15], %25 {strides = array<i32>} : memref<16x128xbf16, #tpu.memory_space<vmem>>, vector<16x128xbf16>,
    return
  }
  func.func @transform_0(%arg0: i32) -> (i32, i32) {
    %c0_i32 = arith.constant 0 : i32
    %c0_i32_0 = arith.constant 0 : i32
    return %arg0, %c0_i32 : i32, i32
  }
  func.func @transform_1(%arg0: i32) -> (i32, i32) {
    %c0_i32 = arith.constant 0 : i32
    %c0_i32_0 = arith.constant 0 : i32
    %c0_i32_1 = arith.constant 0 : i32
    return %c0_i32, %c0_i32_0 : i32, i32
  }
  func.func @transform_2(%arg0: i32) -> (i32, i32) {
    %c0_i32 = arith.constant 0 : i32
    %c0_i32_0 = arith.constant 0 : i32
    %c0_i32_1 = arith.constant 0 : i32
    return %c0_i32, %c0_i32_0 : i32, i32
  }
  func.func @transform_3(%arg0: i32) -> (i32, i32) {
    %c0_i32 = arith.constant 0 : i32
    %c0_i32_0 = arith.constant 0 : i32
    %c0_i32_1 = arith.constant 0 : i32
    return %c0_i32, %c0_i32_0 : i32, i32
  }
  func.func @transform_4(%arg0: i32) -> (i32, i32) {
    %c0_i32 = arith.constant 0 : i32
    %c0_i32_0 = arith.constant 0 : i32
    %c0_i32_1 = arith.constant 0 : i32
    return %c0_i32, %c0_i32_0 : i32, i32
  }
  func.func @transform_5(%arg0: i32) -> (i32, i32) {
    %c0_i32 = arith.constant 0 : i32
    %c0_i32_0 = arith.constant 0 : i32
    return %arg0, %c0_i32 : i32, i32
  }
}

module attributes {stable_mosaic.version = 11 : i64} {
  func.func @_ffn_kernel(%arg0: i32, %arg1: memref<16x128xbf16, #tpu.memory_space<vmem>>, %arg2: memref<128x256xbf16, #tpu.memory_space<vmem>>, %arg3: memref<1x256xf32, #tpu.memory_space<vmem>>, %arg4: memref<256x128xbf16, #tpu.memory_space<vmem>>, %arg5: memref<1x128xf32, #tpu.memory_space<vmem>>, %arg6: memref<16x128xbf16, #tpu.memory_space<vmem>>) attributes {dimension_semantics = [#tpu.dimension_semantics<parallel>], iteration_bounds = array<i64: 2>, scalar_prefetch = 0 : i64, scratch_operands = 0 : i64, tpu.core_type = #tpu.core_type<tc>, window_params = [{transform_indices = @transform_0, window_bounds = array<i64: 16, 128>}, {pipeline_mode = #tpu.pipeline_mode<synchronous>, transform_indices = @transform_1, window_bounds = array<i64: 128, 256>}, {pipeline_mode = #tpu.pipeline_mode<synchronous>, transform_indices = @transform_2, window_bounds = array<i64: 1, 256>}, {pipeline_mode = #tpu.pipeline_mode<synchronous>, transform_indices = @transform_3, window_bounds = array<i64: 256, 128>}, {pipeline_mode = #tpu.pipeline_mode<synchronous>, transform_indices = @transform_4, window_bounds = array<i64: 1, 128>}, {transform_indices = @transform_5, window_bounds = array<i64: 16, 128>}]} {
    %c0 = arith.constant 0 : index
    %c0_0 = arith.constant 0 : index
    %0 = vector.load %arg1[%c0, %c0_0] : memref<16x128xbf16, #tpu.memory_space<vmem>>, vector<16x128xbf16>
    %c0_1 = arith.constant 0 : index
    %c0_2 = arith.constant 0 : index
    %1 = vector.load %arg2[%c0_1, %c0_2] : memref<128x256xbf16, #tpu.memory_space<vmem>>, vector<128x256xbf16>
    %cst = arith.constant dense<0.000000e+00> : vector<16x256xf32>
    %2 = tpu.matmul %0, %1, %cst {dimension_numbers = #tpu.dot_dimension_numbers<[1], [0], [0], [1], [0, 0, 1, 1], [], []>} : vector<16x128xbf16>, vector<128x256xbf16>, vector<16x256xf32> -> vector<16x256xf32>
    %c0_3 = arith.constant 0 : index
    %c0_4 = arith.constant 0 : index
    %3 = vector.load %arg3[%c0_3, %c0_4] : memref<1x256xf32, #tpu.memory_space<vmem>>, vector<1x256xf32>
    %4 = vector.broadcast %3 : vector<1x256xf32> to vector<16x256xf32>
    %5 = arith.addf %2, %4 : vector<16x256xf32>
    %6 = arith.mulf %5, %5 : vector<16x256xf32>
    %7 = arith.mulf %5, %6 : vector<16x256xf32>
    %cst_5 = arith.constant 4.471500e-02 : f32
    %8 = vector.broadcast %cst_5 : f32 to vector<16x256xf32>
    %9 = arith.mulf %8, %7 : vector<16x256xf32>
    %10 = arith.addf %5, %9 : vector<16x256xf32>
    %cst_6 = arith.constant 0.797884583 : f32
    %11 = vector.broadcast %cst_6 : f32 to vector<16x256xf32>
    %12 = arith.mulf %11, %10 : vector<16x256xf32>
    %13 = math.tanh %12 : vector<16x256xf32>
    %cst_7 = arith.constant 1.000000e+00 : f32
    %14 = vector.broadcast %cst_7 : f32 to vector<16x256xf32>
    %15 = arith.addf %14, %13 : vector<16x256xf32>
    %cst_8 = arith.constant 5.000000e-01 : f32
    %16 = vector.broadcast %cst_8 : f32 to vector<16x256xf32>
    %17 = arith.mulf %16, %15 : vector<16x256xf32>
    %18 = arith.mulf %5, %17 : vector<16x256xf32>
    %19 = arith.truncf %18 : vector<16x256xf32> to vector<16x256xbf16>
    %c0_9 = arith.constant 0 : index
    %c0_10 = arith.constant 0 : index
    %20 = vector.load %arg4[%c0_9, %c0_10] : memref<256x128xbf16, #tpu.memory_space<vmem>>, vector<256x128xbf16>
    %cst_11 = arith.constant dense<0.000000e+00> : vector<16x128xf32>
    %21 = tpu.matmul %19, %20, %cst_11 {dimension_numbers = #tpu.dot_dimension_numbers<[1], [0], [0], [1], [0, 0, 1, 1], [], []>} : vector<16x256xbf16>, vector<256x128xbf16>, vector<16x128xf32> -> vector<16x128xf32>
    %c0_12 = arith.constant 0 : index
    %c0_13 = arith.constant 0 : index
    %22 = vector.load %arg5[%c0_12, %c0_13] : memref<1x128xf32, #tpu.memory_space<vmem>>, vector<1x128xf32>
    %23 = vector.broadcast %22 : vector<1x128xf32> to vector<16x128xf32>
    %24 = arith.addf %21, %23 : vector<16x128xf32>
    %25 = arith.truncf %24 : vector<16x128xf32> to vector<16x128xbf16>
    %c0_14 = arith.constant 0 : index
    %c0_15 = arith.constant 0 : index
    %26 = vector.load %arg6[%c0_14, %c0_15] : memref<16x128xbf16, #tpu.memory_space<vmem>>, vector<16x128xbf16>
    tpu.vector_store %arg6[%c0_14, %c0_15], %25 {strides = array<i32>} : memref<16x128xbf16, #tpu.memory_space<vmem>>, vector<16x128xbf16>,
    return
  }
  func.func @transform_0(%arg0: i32) -> (i32, i32) {
    %c0_i32 = arith.constant 0 : i32
    %c0_i32_0 = arith.constant 0 : i32
    return %arg0, %c0_i32 : i32, i32
  }
  func.func @transform_1(%arg0: i32) -> (i32, i32) {
    %c0_i32 = arith.constant 0 : i32
    %c0_i32_0 = arith.constant 0 : i32
    %c0_i32_1 = arith.constant 0 : i32
    return %c0_i32, %c0_i32_0 : i32, i32
  }
  func.func @transform_2(%arg0: i32) -> (i32, i32) {
    %c0_i32 = arith.constant 0 : i32
    %c0_i32_0 = arith.constant 0 : i32
    %c0_i32_1 = arith.constant 0 : i32
    return %c0_i32, %c0_i32_0 : i32, i32
  }
  func.func @transform_3(%arg0: i32) -> (i32, i32) {
    %c0_i32 = arith.constant 0 : i32
    %c0_i32_0 = arith.constant 0 : i32
    %c0_i32_1 = arith.constant 0 : i32
    return %c0_i32, %c0_i32_0 : i32, i32
  }
  func.func @transform_4(%arg0: i32) -> (i32, i32) {
    %c0_i32 = arith.constant 0 : i32
    %c0_i32_0 = arith.constant 0 : i32
    %c0_i32_1 = arith.constant 0 : i32
    return %c0_i32, %c0_i32_0 : i32, i32
  }
  func.func @transform_5(%arg0: i32) -> (i32, i32) {
    %c0_i32 = arith.constant 0 : i32
    %c0_i32_0 = arith.constant 0 : i32
    return %arg0, %c0_i32 : i32, i32
  }
}

</mosaic_0001>

<bundles_post_ra>
// kernel: tpu_custom_call.1
= control target key start
LH: loop header
LB: loop body
LE: loop exit
PB: predicated region body
PF: predicated region fallthrough
CT: control target
= control target key end

     0   :  { %10 = vsyncpa [#allocation3], 0  ;;  %s1370_s0 = inlined_call_operand.hbm [shape: bf16[32,128], index: 0, kind: input, shape index: {}]   ;;  %s1371_s1 = inlined_call_operand.hbm [shape: bf16[128,256], index: 1, kind: input, shape index: {}]   ;;  %s1372_s2 = inlined_call_operand.vmem [shape: f32[1,256], index: 2, kind: input, shape index: {}]   ;;  %s1373_s3 = inlined_call_operand.hbm [shape: bf16[256,128], index: 3, kind: input, shape index: {}]   ;;  %s1374_s4 = inlined_call_operand.vmem [shape: f32[1,128], index: 4, kind: input, shape index: {}]   ;;  %s1375_s5 = inlined_call_operand.hbm [shape: bf16[32,128], index: 5, kind: output, shape index: {}]  }
   0x1   :  { %12 = vsyncpa [#allocation3 + $0x1], 0 }
   0x2   :  { %13 = vsyncpa [#allocation6], 0 }
   0x3   :  { %14 = vsyncpa [#allocation4], 0 }
   0x4   :  { %16 = vsyncpa [#allocation4 + $0x1], 0  ;;  %s1163_s18 = smov 0   ;;  %s1165_s19 = smov 0  }
   0x5   :  { %s1167_s20 = smov 0   ;;  %s1169_s21 = smov 0  }
   0x6 LB: > { %s1184_s22 = sadd.s32 4294967295, %s1120_s21   ;;  %s764_s23 = sadd.s32 4294967294, %s1120_s21   ;;  %s1120_s21 = sphi %s1169_s21, %s1399_s21   ;;  %s1116_s20 = sphi %s1167_s20, %s1398_s20   ;;  %s1112_s19 = sphi %s1165_s19, %s1397_s19   ;;  %s1108_s18 = sphi %s1163_s18, %s1396_s18  }
   0x7   : > { %p42_p0 = scmp.ne.s32.totalorder %s1112_s19, %s1108_s18  ;;  %p1376_p1 = scmp.eq.s32.totalorder %s1184_s22, 0 }
   0x8   : > { %p156_p3 = scmp.eq.s32.totalorder %s764_s23, 1  ;;  %p765_p5 = scmp.ge.s32.totalorder %s1120_s21, 1 }
   0x9   : > { %p1193_p4 = por %p1376_p1, %p42_p0  ;;  %p163_p7 = scmp.lt.s32.totalorder %s1120_s21, 3 }
   0xa   : > { %p1198_p6 = por %p156_p3, %p42_p0  ;;  %s1122_s27 = smov [#allocation5]  }
   0xb   : > { %s1381_s24 = scalar_select %p1193_p4, 1, 0 }
   0xc   : > { %s1382_s25 = scalar_select %p1198_p6, 1, 0 }
   0xd   : > { %p1203_p8 = pnand %p765_p5, %p163_p7  ;;  %s175_s28 = sshll.u32 %s1122_s27, 4  ;;  %s176_s28 = int_to_ptr.vmem [resolvable:$true] %s175_s28 }
   0xe   : > { %s1123_s30 = smov [#allocation7]   ;;  %s983_s7 = scalar_lea.vmem %s176_s28, 2048 }
   0xf   : > { %s1383_s26 = scalar_select %p1203_p8, 1, 0 }
  0x10   : > { %p861_p9 = pneg %p1203_p8  ;;  %s191_s6 = sshll.u32 %s1123_s30, 4  ;;  %s192_s6 = int_to_ptr.vmem [resolvable:$true] %s191_s6 }
  0x11   : > { %p984_p13 = scmp.ne.s32.totalorder %s176_s28, %s983_s7  ;;  %p991_p5 = scmp.lt.s32.totalorder %s176_s28, %s176_s28 }
  0x12   : > { %p1212_p11 = pnand %p861_p9, %p1376_p1  ;;  %p992_p7 = scmp.lt.s32.totalorder %s983_s7, %s983_s7 }
  0x14   : > { %p974_p12 = pneg %p1212_p11  ;;  %p993_p10 = por %p992_p7, %p991_p5 }
  0x16   : > { %p986_p0 = pnand %p984_p13, %p974_p12 }
  0x18   : > { %p987_p3 = pneg %p986_p0 }
  0x1a   : > { %p994_p9 = pnand %p993_p10, %p987_p3 }
  0x1c   : > { %997 = shalt.err (!%p994_p9)
}
  0x1d   : > { %s1124_s8 = smov 128   ;;  %s1125_s9 = smov 8  }
  0x1e   : > { %864 = dma.hbm_to_vmem [thread:$0]  (!%p1212_p11), %s1371_s1, 2048, %s176_s28, [#allocation6], %s1124_s8, %s1124_s8, %s1125_s9  }
  0x1f   : > { %s1009_s12 = scalar_lea.vmem %s192_s6, 2048  ;;  %p1017_p2 = scmp.lt.s32.totalorder %s192_s6, %s192_s6 }
  0x20   : > { %p1010_p1 = scmp.ne.s32.totalorder %s192_s6, %s1009_s12  ;;  %p1018_p6 = scmp.lt.s32.totalorder %s1009_s12, %s1009_s12 }
  0x22   : > { %p1012_p13 = pnand %p1010_p1, %p974_p12  ;;  %p1019_p5 = por %p1018_p6, %p1017_p2 }
  0x24   : > { %p1013_p0 = pneg %p1012_p13 }
  0x26   : > { %p1020_p10 = pnand %p1019_p5, %p1013_p0 }
  0x28   : > { %1023 = shalt.err (!%p1020_p10)
}
  0x29   : > { %s1377_s13 = smov 64   ;;  %s1127_s14 = smov 4  }
  0x2a   : > { %867 = dma.hbm_to_vmem [thread:$0]  (!%p1212_p11), %s1373_s3, 2048, %s192_s6, [#allocation6], %s1377_s13, %s1377_s13, %s1127_s14  }
  0x2b   : > { %s1238_s17 = sadd.s32 1, %s1120_s21   ;;  %s29_s27 = sadd.s32 1, %s1116_s20 }
  0x2c   : > { %s26_s23 = ssub.s32 %s1120_s21, %s1238_s17  ;;  %p36_p2 = scmp.ne.s32.totalorder %s1116_s20, %s1112_s19 }
  0x2d   : > { %p27_p1 = scmp.eq.s32.totalorder %s26_s23, 0  ;;  %p37_p6 = scmp.eq.s32.totalorder %s1120_s21, 0 }
  0x2e   : > { %p1385_p3 = scmp.eq.s32.totalorder %s1184_s22, 1  ;;  %p878_p9 = scmp.lt.s32.totalorder %s1120_s21, 2 }
  0x2f   : > { %s1247_s28 = scalar_select %p27_p1, %s1116_s20, %s29_s27  }
  0x30   : > { %p38_p12 = por %p37_p6, %p36_p2  ;;  %p1251_p7 = por %p1385_p3, %p36_p2 }
  0x31   : > { %s208_s30 = sand.u32 1, %s1116_s20   ;;  %s818_s6 = sshll.u32 %s1120_s21, 7 }
  0x32   : > { %s1386_s29 = scalar_select %p1251_p7, 1, 0 }
  0x33   : > { %s769_s7 = sshll.u32 %s208_s30, 3  ;;  %s1261_s10 = scalar_lea.hbm %s1370_s0, %s818_s6 }
  0x34   : > { %s212_s11 = scalar_lea.vmem [#allocation2], %s769_s7  ;;  %p1265_p11 = pnand %p878_p9, %p38_p12 }
  0x35   : > { %s219_s12 = sshll.u32 %s212_s11, 4  ;;  %s1269_s16 = scalar_lea.sflag [#allocation3], %s208_s30  ;;  %s1263_s12 = int_to_ptr.vmem [resolvable:$true] %s219_s12 }
  0x36   : > { %s1024_s23 = scalar_lea.hbm %s1261_s10, 128  ;;  %p1026_p0 = pneg %p1265_p11 }
  0x37   : > { %p1025_p13 = scmp.ne.s32.totalorder %s1261_s10, %s1024_s23  ;;  %s1029_s7 = scalar_lea.hbm %s1370_s0, 256 }
  0x38   : > { %p1030_p1 = scmp.lt.s32.totalorder %s1261_s10, %s1370_s0  ;;  %p1031_p2 = scmp.lt.s32.totalorder %s1029_s7, %s1024_s23 }
  0x39   : > { %p1027_p5 = pnand %p1026_p0, %p1025_p13 }
  0x3a   : > { %p1032_p6 = por %p1031_p2, %p1030_p1 }
  0x3b   : > { %p1028_p10 = pneg %p1027_p5 }
  0x3d   : > { %p1033_p12 = pnand %p1032_p6, %p1028_p10 }
  0x3f   : > { %1036 = shalt.err (!%p1033_p12)
}
  0x40   : > { %s1037_s30 = scalar_lea.vmem %s1263_s12, 128  ;;  %s1128_s11 = smov [#allocation2]  }
  0x41   : > { %p1038_p3 = scmp.ne.s32.totalorder %s1263_s12, %s1037_s30  ;;  %s1042_s13 = sshll.u32 %s1128_s11, 4  ;;  %s1043_s13 = int_to_ptr.vmem [resolvable:$false] %s1042_s13 }
  0x42   : > { %s1044_s27 = scalar_lea.vmem %s1043_s13, 256  ;;  %p1045_p5 = scmp.lt.s32.totalorder %s1263_s12, %s1043_s13 }
  0x43   : > { %p1040_p9 = pnand %p1038_p3, %p1026_p0  ;;  %p1046_p7 = scmp.lt.s32.totalorder %s1044_s27, %s1037_s30 }
  0x45   : > { %p1041_p13 = pneg %p1040_p9  ;;  %p1047_p4 = por %p1046_p7, %p1045_p5 }
  0x47   : > { %p1048_p8 = pnand %p1047_p4, %p1041_p13 }
  0x49   : > { %1051 = shalt.err (!%p1048_p8)
}
  0x4a   : > { %s1388_s23 = smov 64   ;;  %p1389_p0 = scmp.ne.s32.totalorder %s1383_s26, 0 }
  0x4b   : > { %871 = dma.hbm_to_vmem [thread:$0]  (!%p1265_p11), %s1261_s10, 128, %s1263_s12, %s1269_s16, %s1388_s23, %s1388_s23, %s1127_s14  }
  0x4c   : > { %231 = sbr.rel (%p1389_p0) target bundleno = 571 (0x23b), region = 40  ;;  %s1296_s6 = sand.u32 (!%p1389_p0), 1, %s1112_s19  }
  0x4d   : > { %s773_s13 = sshll.u32 (!%p1389_p0), %s1296_s6, 3  ;;  %s234_s7 = scalar_lea.sflag (!%p1389_p0), [#allocation3], %s1296_s6 }
  0x4e   : > { %s1302_s15 = scalar_lea.vmem (!%p1389_p0), [#allocation2], %s773_s13  ;;  %p1390_p4 = scmp.ne.s32.totalorder (!%p1389_p0), %s1381_s24, 0 }
  0x51   : > { %1095 = dma.done.wait (%p1390_p4), %s234_s7, 128  }
  0x52   : > { %1097 = vsyncadd (%p1390_p4), %s234_s7, 4294967168  ;;  %p1391_p8 = scmp.eq.s32.totalorder %s1184_s22, 0 }
  0x54   : > { %1099 = dma.done.wait (%p1391_p8), [#allocation6], 4096   ;;  %p1392_p7 = pmov %p1391_p8 }
  0x55   : > { %v1129_v0 = vmov 0   ;;  %v923_v1 = vld [vmem:[#allocation5 + $0x74] ss:$8 sps:$4 sm:$0xff]   ;;  %v925_v2 = vld [vmem:[#allocation5 + $0x70] ss:$8 sps:$4 sm:$0xff]   ;;  %v952_v22 = vld [vmem:[#allocation7 + $0x68] sm:$0xff]   ;;  %v295_v34 = vlaneseq }
  0x56   : > { %1101 = vsyncadd (%p1392_p7), [#allocation6], 4294963200  ;;  %423 = vmatprep.mubr.bf16.mxu0 %v1129_v0  ;;  %391 = vmatprep.subr.bf16.mxu0 %v923_v1  ;;  %v926_v3 = vld [vmem:[#allocation5 + $0x64] ss:$8 sps:$4 sm:$0xff]   ;;  %v928_v4 = vld [vmem:[#allocation5 + $0x60] ss:$8 sps:$4 sm:$0xff]  }
  0x57   : > { %392 = vmatpush1.bf16.msra.mxu0 %v925_v2  ;;  %v929_v5 = vld [vmem:[#allocation5 + $0x54] ss:$8 sps:$4 sm:$0xff]   ;;  %v931_v6 = vld [vmem:[#allocation5 + $0x50] ss:$8 sps:$4 sm:$0xff]   ;;  %v932_v7 = vld [vmem:[#allocation5 + $0x44] ss:$8 sps:$4 sm:$0xff]  }
  0x58   : > { %393 = vmatprep.subr.bf16.mxu0 %v926_v3  ;;  %v934_v8 = vld [vmem:[#allocation5 + $0x40] ss:$8 sps:$4 sm:$0xff]   ;;  %v935_v9 = vld [vmem:[#allocation5 + $0x34] ss:$8 sps:$4 sm:$0xff]   ;;  %v937_v10 = vld [vmem:[#allocation5 + $0x30] ss:$8 sps:$4 sm:$0xff]  }
  0x59   : > { %v938_v11 = vld [vmem:[#allocation5 + $0x24] ss:$8 sps:$4 sm:$0xff]   ;;  %v940_v12 = vld [vmem:[#allocation5 + $0x20] ss:$8 sps:$4 sm:$0xff]   ;;  %v941_v13 = vld [vmem:[#allocation5 + $0x14] ss:$8 sps:$4 sm:$0xff]  }
  0x5a   : > { %v943_v14 = vld [vmem:[#allocation5 + $0x10] ss:$8 sps:$4 sm:$0xff]   ;;  %v944_v15 = vld [vmem:[#allocation5 + $0x4] ss:$8 sps:$4 sm:$0xff]   ;;  %v946_v16 = vld [vmem:[#allocation5] ss:$8 sps:$4 sm:$0xff]  }
  0x5b   : > { %394 = vmatpush1.bf16.msra.mxu0 %v928_v4  ;;  %v947_v17 = vld [vmem:[%s1302_s15] sm:$0xff]   ;;  %v953_v23 = vld [vmem:[#allocation7 + $0x28] sm:$0xff]   ;;  %v954_v24 = vld [vmem:[#allocation7 + $0x60] sm:$0xff]   ;;  %v296_v35 = vshrl.u32 %v295_v34, 7  ;;  %s821_s12 = sshll.u32 %s1184_s22, 7  ;;  %s271_s16 = scalar_lea.vmem [#allocation8], %s773_s13 }
  0x5c   : > { %395 = vmatprep.subr.bf16.mxu0 %v929_v5  ;;  %v948_v18 = vld [vmem:[#allocation7 + $0x78] sm:$0xff]   ;;  %v950_v20 = vld [vmem:[#allocation7 + $0x70] sm:$0xff]   ;;  %v955_v25 = vld [vmem:[#allocation7 + $0x20] sm:$0xff]   ;;  %s672_s8 = sshll.u32 %s271_s16, 4  ;;  %s1325_s11 = scalar_lea.hbm %s1375_s5, %s821_s12  ;;  %s1327_s8 = int_to_ptr.vmem [resolvable:$true] %s672_s8 }
  0x5d   : > { %v949_v19 = vld [vmem:[#allocation7 + $0x38] sm:$0xff]   ;;  %827 = vmatprep.subr.bf16.mxu1 %v948_v18  ;;  %v951_v21 = vld [vmem:[#allocation7 + $0x30] sm:$0xff]   ;;  %v960_v30 = vld [vmem:[#allocation7 + $0x48] sm:$0xff]   ;;  %v297_v36 = vsub.s32 0, %v296_v35  ;;  %v301_v38 = vsub.s32 1, %v296_v35  ;;  %s659_s27 = scalar_lea.sflag [#allocation4], %s1296_s6 }
  0x5e   : > { %828 = vmatpush3.bf16.msra.mxu1 %v949_v19  ;;  %v956_v26 = vld [vmem:[#allocation7 + $0x58] sm:$0xff]   ;;  %v958_v28 = vld [vmem:[#allocation7 + $0x50] sm:$0xff]   ;;  %v961_v31 = vld [vmem:[#allocation7 + $0x8] sm:$0xff]   ;;  %s1052_s23 = scalar_lea.vmem %s1327_s8, 128  ;;  %p1393_p10 = scmp.ne.s32.totalorder %s1386_s29, 0 }
  0x5f   : > { %396 = vmatpush1.bf16.msra.mxu0 %v931_v6  ;;  %829 = vmatprep.subr.bf16.mxu1 %v950_v20  ;;  %v957_v27 = vld [vmem:[#allocation7 + $0x18] sm:$0xff]   ;;  %v959_v29 = vld [vmem:[#allocation7 + $0x10] sm:$0xff]   ;;  %v962_v32 = vld [vmem:[#allocation7 + $0x40] sm:$0xff]   ;;  %p1053_p11 = scmp.ne.s32.totalorder %s1327_s8, %s1052_s23  ;;  %s1130_s22 = smov [#allocation8]  }
  0x60   : > { %397 = vmatprep.subr.bf16.mxu0 %v932_v7  ;;  %v963_v33 = vld [vmem:[#allocation7] sm:$0xff]   ;;  %v293_v37 = vld [vmem:[%s1372_s2] sm:$0x3]  ;;  %s1056_s13 = sshll.u32 %s1130_s22, 4  ;;  %s1057_s13 = int_to_ptr.vmem [resolvable:$false] %s1056_s13 }
  0x61   : > { %v298_v39 = vrot.slane %v293_v37, %v297_v36  ;;  %v302_v40 = vrot.slane %v293_v37, %v301_v38  ;;  %p1054_p1 = pnand %p1053_p11, %p1393_p10  ;;  %s1058_s7 = scalar_lea.vmem %s1057_s13, 256 }
  0x62   : > { %830 = vmatpush3.bf16.msra.mxu1 %v951_v21  ;;  %p1059_p6 = scmp.lt.s32.totalorder %s1327_s8, %s1057_s13  ;;  %p1060_p12 = scmp.lt.s32.totalorder %s1058_s7, %s1052_s23 }
  0x63   : > { %398 = vmatpush1.bf16.msra.mxu0 %v934_v8  ;;  %831 = vmatprep.subr.bf16.mxu1 %v952_v22  ;;  %p1055_p2 = pneg %p1054_p1 }
  0x64   : > { %399 = vmatprep.subr.bf16.mxu0 %v935_v9  ;;  %p1061_p3 = por %p1060_p12, %p1059_p6 }
  0x66   : > { %832 = vmatpush3.bf16.msra.mxu1 %v953_v23  ;;  %p1062_p9 = pnand %p1061_p3, %p1055_p2 }
  0x67   : > { %400 = vmatpush1.bf16.msra.mxu0 %v937_v10  ;;  %833 = vmatprep.subr.bf16.mxu1 %v954_v24 }
  0x68   : > { %401 = vmatprep.subr.bf16.mxu0 %v938_v11 }
  0x6a   : > { %834 = vmatpush3.bf16.msra.mxu1 %v955_v25 }
  0x6b   : > { %402 = vmatpush1.bf16.msra.mxu0 %v940_v12  ;;  %835 = vmatprep.subr.bf16.mxu1 %v956_v26 }
  0x6c   : > { %403 = vmatprep.subr.bf16.mxu0 %v941_v13 }
  0x6e   : > { %836 = vmatpush3.bf16.msra.mxu1 %v957_v27  ;;  %v794_v27 = vld [vmem:[%s1374_s4] ss:$0 sm:$0xff] }
  0x6f   : > { %404 = vmatpush1.bf16.msra.mxu0 %v943_v14  ;;  %837 = vmatprep.subr.bf16.mxu1 %v958_v28 }
  0x70   : > { %405 = vmatprep.subr.bf16.mxu0 %v944_v15 }
  0x72   : > { %838 = vmatpush3.bf16.msra.mxu1 %v959_v29 }
  0x73   : > { %406 = vmatpush1.bf16.msra.mxu0 %v946_v16  ;;  %839 = vmatprep.subr.bf16.mxu1 %v960_v30 }
  0x76   : > { %424 = vmatmul.mubr.bf16.vlgmr.msra.gmra.mxu0 %v947_v17  ;;  %840 = vmatpush3.bf16.msra.mxu1 %v961_v31 }
  0x77   : > { %841 = vmatprep.subr.bf16.mxu1 %v962_v32 }
  0x7a   : > { %842 = vmatpush3.bf16.msra.mxu1 %v963_v33 }
 0x136   : > { %v425_v41 = vpop.f32.mrf.mxu0 }
 0x137   : > { %v426_v42 = vadd.f32 %v425_v41, %v298_v39 }
 0x138   : > { %v427_v43 = vpop.f32.mrf.mxu0 }
 0x139   : > { %v434_v44 = vmul.f32 %v426_v42, %v426_v42  ;;  %v428_v45 = vadd.f32 %v427_v43, %v302_v40 }
 0x13a   : > { %v429_v46 = vpop.f32.mrf.mxu0 }
 0x13b   : > { %v438_v47 = vmul.f32 %v434_v44, %v426_v42  ;;  %v435_v48 = vmul.f32 %v428_v45, %v428_v45  ;;  %v430_v49 = vadd.f32 %v429_v46, %v298_v39 }
 0x13c   : > { %v431_v50 = vpop.f32.mrf.mxu0 }
 0x13d   : > { %v442_v51 = vmul.f32 0.044715, %v438_v47  ;;  %v439_v52 = vmul.f32 %v435_v48, %v428_v45  ;;  %v436_v53 = vmul.f32 %v430_v49, %v430_v49  ;;  %v432_v54 = vadd.f32 %v431_v50, %v302_v40 }
 0x13f   : > { %v446_v55 = vadd.f32 %v442_v51, %v426_v42  ;;  %v443_v56 = vmul.f32 0.044715, %v439_v52  ;;  %v440_v57 = vmul.f32 %v436_v53, %v430_v49  ;;  %v437_v58 = vmul.f32 %v432_v54, %v432_v54 }
 0x141   : > { %v450_v59 = vmul.f32 0.7978846, %v446_v55  ;;  %v447_v60 = vadd.f32 %v443_v56, %v428_v45  ;;  %v444_v61 = vmul.f32 0.044715, %v440_v57  ;;  %v441_v62 = vmul.f32 %v437_v58, %v432_v54 }
 0x143   : > { %v448_v63 = vadd.f32 %v444_v61, %v430_v49  ;;  %v445_v0 = vmul.f32 0.044715, %v441_v62  ;;  %v451_v1 = vmul.f32 0.7978846, %v447_v60  ;;  %964 = vtanh.f32 %v450_v59 }
 0x145   : > { %v452_v2 = vmul.f32 0.7978846, %v448_v63  ;;  %v449_v3 = vadd.f32 %v445_v0, %v432_v54  ;;  %966 = vtanh.f32 %v451_v1 }
 0x147   : > { %968 = vtanh.f32 %v452_v2  ;;  %v453_v4 = vmul.f32 0.7978846, %v449_v3 }
 0x149   : > { %970 = vtanh.f32 %v453_v4 }
 0x150   : > { %v965_v5 = vpop.eup %964 }
 0x151   : > { %v458_v9 = vadd.f32 1.0, %v965_v5 }
 0x152   : > { %v967_v6 = vpop.eup %966 }
 0x153   : > { %v459_v7 = vadd.f32 1.0, %v967_v6  ;;  %v462_v15 = vmul.f32 0.5, %v458_v9 }
 0x154   : > { %v969_v8 = vpop.eup %968 }
 0x155   : > { %v460_v10 = vadd.f32 1.0, %v969_v8  ;;  %v463_v13 = vmul.f32 0.5, %v459_v7  ;;  %v466_v20 = vmul.f32 %v462_v15, %v426_v42 }
 0x156   : > { %v971_v11 = vpop.eup %970 }
 0x157   : > { %v461_v12 = vadd.f32 1.0, %v971_v11  ;;  %v464_v14 = vmul.f32 0.5, %v460_v10  ;;  %v467_v18 = vmul.f32 %v463_v13, %v428_v45 }
 0x159   : > { %v465_v16 = vmul.f32 0.5, %v461_v12  ;;  %v468_v17 = vmul.f32 %v464_v14, %v430_v49 }
 0x15b   : > { %v469_v19 = vmul.f32 %v465_v16, %v432_v54  ;;  %v470_v22 = vpack.c.bf16 %v468_v17, %v466_v20 }
 0x15d   : > { %v471_v21 = vpack.c.bf16 %v469_v19, %v467_v18 }
 0x15f   : > { %639 = vmatprep.mubr.bf16.mxu1 %v471_v21 }
 0x160   : > { %640 = vmatmul.mubr.bf16.vlgmr.msra.gmra.mxu1 %v470_v22 }
 0x220   : > { %v843_v23 = vpop.f32.mrf.mxu1 }
 0x222   : > { %v844_v24 = vpop.f32.mrf.mxu1 }
 0x223   : > { %v845_v26 = vadd.f32 %v844_v24, %v843_v23 }
 0x224   : > { %v846_v25 = vpop.f32.mrf.mxu1 }
 0x225   : > { %v642_v30 = vadd.f32 %v845_v26, %v794_v27 }
 0x226   : > { %v847_v28 = vpop.f32.mrf.mxu1 }
 0x227   : > { %v848_v29 = vadd.f32 %v847_v28, %v846_v25 }
 0x229   : > { %v645_v31 = vadd.f32 %v848_v29, %v794_v27 }
 0x22b   : > { %v825_v32 = vpack.c.bf16 %v645_v31, %v642_v30 }
 0x22d   : > { %826 = vst [vmem:[%s271_s16] sm:$0xff] %v825_v32  }
 0x22e   : > { %1065 = shalt.err (!%p1062_p9)
}
 0x22f   : > { %s1066_s15 = scalar_lea.hbm %s1325_s11, 128  ;;  %s1070_s14 = scalar_lea.hbm %s1375_s5, 256 }
 0x230   : > { %p1067_p13 = scmp.ne.s32.totalorder %s1325_s11, %s1066_s15  ;;  %p1071_p4 = scmp.lt.s32.totalorder %s1325_s11, %s1375_s5 }
 0x231   : > { %p1072_p8 = scmp.lt.s32.totalorder %s1070_s14, %s1066_s15 }
 0x232   : > { %p1068_p5 = pnand %p1067_p13, %p1393_p10 }
 0x233   : > { %p1073_p7 = por %p1072_p8, %p1071_p4 }
 0x234   : > { %p1069_p0 = pneg %p1068_p5 }
 0x236   : > { %p1074_p11 = pnand %p1073_p7, %p1069_p0 }
 0x238   : > { %1077 = shalt.err (!%p1074_p11)
}
 0x239   : > { %s1131_s16 = smov 64   ;;  %s1132_s9 = smov 4  }
 0x23a   : > { %859 = dma.vmem_to_hbm [thread:$0]  (%p1393_p10), %s1327_s8, 128, %s1325_s11, %s659_s27, %s1131_s16, %s1131_s16, %s1132_s9  }
 0x23b PF: > { %s687_s30 = sand.u32 1, %s1108_s18   ;;  %p1394_p1 = scmp.ne.s32.totalorder %s1382_s25, 0 }
 0x23c   : > { %p1395_p2 = scmp.ge.s32.totalorder %s1120_s21, 2  ;;  %s688_s23 = scalar_lea.sflag [#allocation4], %s687_s30 }
 0x23e   : > { %p873_p6 = pnand %p1395_p2, %p1394_p1 }
 0x240   : > { %p874_p12 = pneg %p873_p6 }
 0x242   : > { %1103 = dma.done.wait (%p874_p12), %s688_s23, 128  }
 0x243   : > { %1105 = vsyncadd (%p874_p12), %s688_s23, 4294967168  ;;  %p19_p3 = scmp.ge.s32.totalorder %s1238_s17, 4   ;;  %s1396_s18 = smov %s1112_s19 }
 0x244   : > { %s1397_s19 = smov %s1116_s20  ;;  %s1398_s20 = smov %s1247_s28 }
 0x245   : > { %s1399_s21 = smov %s1238_s17  ;;  %21 = sbr.rel (!%p19_p3) target bundleno = 6 (0x6), region = 93 }
 0x24a   :  { %693 = vsyncpa [#allocation3], 1 }
 0x24b   :  { %695 = vsyncpa [#allocation3 + $0x1], 1 }
 0x24c   :  { %696 = vsyncpa [#allocation6], 1 }
 0x24d   :  { %697 = vsyncpa [#allocation4], 1 }
 0x24e   :  { %699 = vsyncpa [#allocation4 + $0x1], 1 }

// kernel: tpu_custom_call.1
= control target key start
LH: loop header
LB: loop body
LE: loop exit
PB: predicated region body
PF: predicated region fallthrough
CT: control target
= control target key end

     0   :  { %10 = vsyncpa [#allocation3], 0  ;;  %s1370_s0 = inlined_call_operand.hbm [shape: bf16[32,128], index: 0, kind: input, shape index: {}]   ;;  %s1371_s1 = inlined_call_operand.hbm [shape: bf16[128,256], index: 1, kind: input, shape index: {}]   ;;  %s1372_s2 = inlined_call_operand.vmem [shape: f32[1,256], index: 2, kind: input, shape index: {}]   ;;  %s1373_s3 = inlined_call_operand.hbm [shape: bf16[256,128], index: 3, kind: input, shape index: {}]   ;;  %s1374_s4 = inlined_call_operand.vmem [shape: f32[1,128], index: 4, kind: input, shape index: {}]   ;;  %s1375_s5 = inlined_call_operand.hbm [shape: bf16[32,128], index: 5, kind: output, shape index: {}]  }
   0x1   :  { %12 = vsyncpa [#allocation3 + $0x1], 0 }
   0x2   :  { %13 = vsyncpa [#allocation6], 0 }
   0x3   :  { %14 = vsyncpa [#allocation4], 0 }
   0x4   :  { %16 = vsyncpa [#allocation4 + $0x1], 0  ;;  %s1163_s18 = smov 0   ;;  %s1165_s19 = smov 0  }
   0x5   :  { %s1167_s20 = smov 0   ;;  %s1169_s21 = smov 0  }
   0x6 LB: > { %s1184_s22 = sadd.s32 4294967295, %s1120_s21   ;;  %s764_s23 = sadd.s32 4294967294, %s1120_s21   ;;  %s1120_s21 = sphi %s1169_s21, %s1399_s21   ;;  %s1116_s20 = sphi %s1167_s20, %s1398_s20   ;;  %s1112_s19 = sphi %s1165_s19, %s1397_s19   ;;  %s1108_s18 = sphi %s1163_s18, %s1396_s18  }
   0x7   : > { %p42_p0 = scmp.ne.s32.totalorder %s1112_s19, %s1108_s18  ;;  %p1376_p1 = scmp.eq.s32.totalorder %s1184_s22, 0 }
   0x8   : > { %p156_p3 = scmp.eq.s32.totalorder %s764_s23, 1  ;;  %p765_p5 = scmp.ge.s32.totalorder %s1120_s21, 1 }
   0x9   : > { %p1193_p4 = por %p1376_p1, %p42_p0  ;;  %p163_p7 = scmp.lt.s32.totalorder %s1120_s21, 3 }
   0xa   : > { %p1198_p6 = por %p156_p3, %p42_p0  ;;  %s1122_s27 = smov [#allocation5]  }
   0xb   : > { %s1381_s24 = scalar_select %p1193_p4, 1, 0 }
   0xc   : > { %s1382_s25 = scalar_select %p1198_p6, 1, 0 }
   0xd   : > { %p1203_p8 = pnand %p765_p5, %p163_p7  ;;  %s175_s28 = sshll.u32 %s1122_s27, 4  ;;  %s176_s28 = int_to_ptr.vmem [resolvable:$true] %s175_s28 }
   0xe   : > { %s1123_s30 = smov [#allocation7]   ;;  %s983_s7 = scalar_lea.vmem %s176_s28, 2048 }
   0xf   : > { %s1383_s26 = scalar_select %p1203_p8, 1, 0 }
  0x10   : > { %p861_p9 = pneg %p1203_p8  ;;  %s191_s6 = sshll.u32 %s1123_s30, 4  ;;  %s192_s6 = int_to_ptr.vmem [resolvable:$true] %s191_s6 }
  0x11   : > { %p984_p13 = scmp.ne.s32.totalorder %s176_s28, %s983_s7  ;;  %p991_p5 = scmp.lt.s32.totalorder %s176_s28, %s176_s28 }
  0x12   : > { %p1212_p11 = pnand %p861_p9, %p1376_p1  ;;  %p992_p7 = scmp.lt.s32.totalorder %s983_s7, %s983_s7 }
  0x14   : > { %p974_p12 = pneg %p1212_p11  ;;  %p993_p10 = por %p992_p7, %p991_p5 }
  0x16   : > { %p986_p0 = pnand %p984_p13, %p974_p12 }
  0x18   : > { %p987_p3 = pneg %p986_p0 }
  0x1a   : > { %p994_p9 = pnand %p993_p10, %p987_p3 }
  0x1c   : > { %997 = shalt.err (!%p994_p9)
}
  0x1d   : > { %s1124_s8 = smov 128   ;;  %s1125_s9 = smov 8  }
  0x1e   : > { %864 = dma.hbm_to_vmem [thread:$0]  (!%p1212_p11), %s1371_s1, 2048, %s176_s28, [#allocation6], %s1124_s8, %s1124_s8, %s1125_s9  }
  0x1f   : > { %s1009_s12 = scalar_lea.vmem %s192_s6, 2048  ;;  %p1017_p2 = scmp.lt.s32.totalorder %s192_s6, %s192_s6 }
  0x20   : > { %p1010_p1 = scmp.ne.s32.totalorder %s192_s6, %s1009_s12  ;;  %p1018_p6 = scmp.lt.s32.totalorder %s1009_s12, %s1009_s12 }
  0x22   : > { %p1012_p13 = pnand %p1010_p1, %p974_p12  ;;  %p1019_p5 = por %p1018_p6, %p1017_p2 }
  0x24   : > { %p1013_p0 = pneg %p1012_p13 }
  0x26   : > { %p1020_p10 = pnand %p1019_p5, %p1013_p0 }
  0x28   : > { %1023 = shalt.err (!%p1020_p10)
}
  0x29   : > { %s1377_s13 = smov 64   ;;  %s1127_s14 = smov 4  }
  0x2a   : > { %867 = dma.hbm_to_vmem [thread:$0]  (!%p1212_p11), %s1373_s3, 2048, %s192_s6, [#allocation6], %s1377_s13, %s1377_s13, %s1127_s14  }
  0x2b   : > { %s1238_s17 = sadd.s32 1, %s1120_s21   ;;  %s29_s27 = sadd.s32 1, %s1116_s20 }
  0x2c   : > { %s26_s23 = ssub.s32 %s1120_s21, %s1238_s17  ;;  %p36_p2 = scmp.ne.s32.totalorder %s1116_s20, %s1112_s19 }
  0x2d   : > { %p27_p1 = scmp.eq.s32.totalorder %s26_s23, 0  ;;  %p37_p6 = scmp.eq.s32.totalorder %s1120_s21, 0 }
  0x2e   : > { %p1385_p3 = scmp.eq.s32.totalorder %s1184_s22, 1  ;;  %p878_p9 = scmp.lt.s32.totalorder %s1120_s21, 2 }
  0x2f   : > { %s1247_s28 = scalar_select %p27_p1, %s1116_s20, %s29_s27  }
  0x30   : > { %p38_p12 = por %p37_p6, %p36_p2  ;;  %p1251_p7 = por %p1385_p3, %p36_p2 }
  0x31   : > { %s208_s30 = sand.u32 1, %s1116_s20   ;;  %s818_s6 = sshll.u32 %s1120_s21, 7 }
  0x32   : > { %s1386_s29 = scalar_select %p1251_p7, 1, 0 }
  0x33   : > { %s769_s7 = sshll.u32 %s208_s30, 3  ;;  %s1261_s10 = scalar_lea.hbm %s1370_s0, %s818_s6 }
  0x34   : > { %s212_s11 = scalar_lea.vmem [#allocation2], %s769_s7  ;;  %p1265_p11 = pnand %p878_p9, %p38_p12 }
  0x35   : > { %s219_s12 = sshll.u32 %s212_s11, 4  ;;  %s1269_s16 = scalar_lea.sflag [#allocation3], %s208_s30  ;;  %s1263_s12 = int_to_ptr.vmem [resolvable:$true] %s219_s12 }
  0x36   : > { %s1024_s23 = scalar_lea.hbm %s1261_s10, 128  ;;  %p1026_p0 = pneg %p1265_p11 }
  0x37   : > { %p1025_p13 = scmp.ne.s32.totalorder %s1261_s10, %s1024_s23  ;;  %s1029_s7 = scalar_lea.hbm %s1370_s0, 256 }
  0x38   : > { %p1030_p1 = scmp.lt.s32.totalorder %s1261_s10, %s1370_s0  ;;  %p1031_p2 = scmp.lt.s32.totalorder %s1029_s7, %s1024_s23 }
  0x39   : > { %p1027_p5 = pnand %p1026_p0, %p1025_p13 }
  0x3a   : > { %p1032_p6 = por %p1031_p2, %p1030_p1 }
  0x3b   : > { %p1028_p10 = pneg %p1027_p5 }
  0x3d   : > { %p1033_p12 = pnand %p1032_p6, %p1028_p10 }
  0x3f   : > { %1036 = shalt.err (!%p1033_p12)
}
  0x40   : > { %s1037_s30 = scalar_lea.vmem %s1263_s12, 128  ;;  %s1128_s11 = smov [#allocation2]  }
  0x41   : > { %p1038_p3 = scmp.ne.s32.totalorder %s1263_s12, %s1037_s30  ;;  %s1042_s13 = sshll.u32 %s1128_s11, 4  ;;  %s1043_s13 = int_to_ptr.vmem [resolvable:$false] %s1042_s13 }
  0x42   : > { %s1044_s27 = scalar_lea.vmem %s1043_s13, 256  ;;  %p1045_p5 = scmp.lt.s32.totalorder %s1263_s12, %s1043_s13 }
  0x43   : > { %p1040_p9 = pnand %p1038_p3, %p1026_p0  ;;  %p1046_p7 = scmp.lt.s32.totalorder %s1044_s27, %s1037_s30 }
  0x45   : > { %p1041_p13 = pneg %p1040_p9  ;;  %p1047_p4 = por %p1046_p7, %p1045_p5 }
  0x47   : > { %p1048_p8 = pnand %p1047_p4, %p1041_p13 }
  0x49   : > { %1051 = shalt.err (!%p1048_p8)
}
  0x4a   : > { %s1388_s23 = smov 64   ;;  %p1389_p0 = scmp.ne.s32.totalorder %s1383_s26, 0 }
  0x4b   : > { %871 = dma.hbm_to_vmem [thread:$0]  (!%p1265_p11), %s1261_s10, 128, %s1263_s12, %s1269_s16, %s1388_s23, %s1388_s23, %s1127_s14  }
  0x4c   : > { %231 = sbr.rel (%p1389_p0) target bundleno = 571 (0x23b), region = 40  ;;  %s1296_s6 = sand.u32 (!%p1389_p0), 1, %s1112_s19  }
  0x4d   : > { %s773_s13 = sshll.u32 (!%p1389_p0), %s1296_s6, 3  ;;  %s234_s7 = scalar_lea.sflag (!%p1389_p0), [#allocation3], %s1296_s6 }
  0x4e   : > { %s1302_s15 = scalar_lea.vmem (!%p1389_p0), [#allocation2], %s773_s13  ;;  %p1390_p4 = scmp.ne.s32.totalorder (!%p1389_p0), %s1381_s24, 0 }
  0x51   : > { %1095 = dma.done.wait (%p1390_p4), %s234_s7, 128  }
  0x52   : > { %1097 = vsyncadd (%p1390_p4), %s234_s7, 4294967168  ;;  %p1391_p8 = scmp.eq.s32.totalorder %s1184_s22, 0 }
  0x54   : > { %1099 = dma.done.wait (%p1391_p8), [#allocation6], 4096   ;;  %p1392_p7 = pmov %p1391_p8 }
  0x55   : > { %v1129_v0 = vmov 0   ;;  %v923_v1 = vld [vmem:[#allocation5 + $0x74] ss:$8 sps:$4 sm:$0xff]   ;;  %v925_v2 = vld [vmem:[#allocation5 + $0x70] ss:$8 sps:$4 sm:$0xff]   ;;  %v952_v22 = vld [vmem:[#allocation7 + $0x68] sm:$0xff]   ;;  %v295_v34 = vlaneseq }
  0x56   : > { %1101 = vsyncadd (%p1392_p7), [#allocation6], 4294963200  ;;  %423 = vmatprep.mubr.bf16.mxu0 %v1129_v0  ;;  %391 = vmatprep.subr.bf16.mxu0 %v923_v1  ;;  %v926_v3 = vld [vmem:[#allocation5 + $0x64] ss:$8 sps:$4 sm:$0xff]   ;;  %v928_v4 = vld [vmem:[#allocation5 + $0x60] ss:$8 sps:$4 sm:$0xff]  }
  0x57   : > { %392 = vmatpush1.bf16.msra.mxu0 %v925_v2  ;;  %v929_v5 = vld [vmem:[#allocation5 + $0x54] ss:$8 sps:$4 sm:$0xff]   ;;  %v931_v6 = vld [vmem:[#allocation5 + $0x50] ss:$8 sps:$4 sm:$0xff]   ;;  %v932_v7 = vld [vmem:[#allocation5 + $0x44] ss:$8 sps:$4 sm:$0xff]  }
  0x58   : > { %393 = vmatprep.subr.bf16.mxu0 %v926_v3  ;;  %v934_v8 = vld [vmem:[#allocation5 + $0x40] ss:$8 sps:$4 sm:$0xff]   ;;  %v935_v9 = vld [vmem:[#allocation5 + $0x34] ss:$8 sps:$4 sm:$0xff]   ;;  %v937_v10 = vld [vmem:[#allocation5 + $0x30] ss:$8 sps:$4 sm:$0xff]  }
  0x59   : > { %v938_v11 = vld [vmem:[#allocation5 + $0x24] ss:$8 sps:$4 sm:$0xff]   ;;  %v940_v12 = vld [vmem:[#allocation5 + $0x20] ss:$8 sps:$4 sm:$0xff]   ;;  %v941_v13 = vld [vmem:[#allocation5 + $0x14] ss:$8 sps:$4 sm:$0xff]  }
  0x5a   : > { %v943_v14 = vld [vmem:[#allocation5 + $0x10] ss:$8 sps:$4 sm:$0xff]   ;;  %v944_v15 = vld [vmem:[#allocation5 + $0x4] ss:$8 sps:$4 sm:$0xff]   ;;  %v946_v16 = vld [vmem:[#allocation5] ss:$8 sps:$4 sm:$0xff]  }
  0x5b   : > { %394 = vmatpush1.bf16.msra.mxu0 %v928_v4  ;;  %v947_v17 = vld [vmem:[%s1302_s15] sm:$0xff]   ;;  %v953_v23 = vld [vmem:[#allocation7 + $0x28] sm:$0xff]   ;;  %v954_v24 = vld [vmem:[#allocation7 + $0x60] sm:$0xff]   ;;  %v296_v35 = vshrl.u32 %v295_v34, 7  ;;  %s821_s12 = sshll.u32 %s1184_s22, 7  ;;  %s271_s16 = scalar_lea.vmem [#allocation8], %s773_s13 }
  0x5c   : > { %395 = vmatprep.subr.bf16.mxu0 %v929_v5  ;;  %v948_v18 = vld [vmem:[#allocation7 + $0x78] sm:$0xff]   ;;  %v950_v20 = vld [vmem:[#allocation7 + $0x70] sm:$0xff]   ;;  %v955_v25 = vld [vmem:[#allocation7 + $0x20] sm:$0xff]   ;;  %s672_s8 = sshll.u32 %s271_s16, 4  ;;  %s1325_s11 = scalar_lea.hbm %s1375_s5, %s821_s12  ;;  %s1327_s8 = int_to_ptr.vmem [resolvable:$true] %s672_s8 }
  0x5d   : > { %v949_v19 = vld [vmem:[#allocation7 + $0x38] sm:$0xff]   ;;  %827 = vmatprep.subr.bf16.mxu1 %v948_v18  ;;  %v951_v21 = vld [vmem:[#allocation7 + $0x30] sm:$0xff]   ;;  %v960_v30 = vld [vmem:[#allocation7 + $0x48] sm:$0xff]   ;;  %v297_v36 = vsub.s32 0, %v296_v35  ;;  %v301_v38 = vsub.s32 1, %v296_v35  ;;  %s659_s27 = scalar_lea.sflag [#allocation4], %s1296_s6 }
  0x5e   : > { %828 = vmatpush3.bf16.msra.mxu1 %v949_v19  ;;  %v956_v26 = vld [vmem:[#allocation7 + $0x58] sm:$0xff]   ;;  %v958_v28 = vld [vmem:[#allocation7 + $0x50] sm:$0xff]   ;;  %v961_v31 = vld [vmem:[#allocation7 + $0x8] sm:$0xff]   ;;  %s1052_s23 = scalar_lea.vmem %s1327_s8, 128  ;;  %p1393_p10 = scmp.ne.s32.totalorder %s1386_s29, 0 }
  0x5f   : > { %396 = vmatpush1.bf16.msra.mxu0 %v931_v6  ;;  %829 = vmatprep.subr.bf16.mxu1 %v950_v20  ;;  %v957_v27 = vld [vmem:[#allocation7 + $0x18] sm:$0xff]   ;;  %v959_v29 = vld [vmem:[#allocation7 + $0x10] sm:$0xff]   ;;  %v962_v32 = vld [vmem:[#allocation7 + $0x40] sm:$0xff]   ;;  %p1053_p11 = scmp.ne.s32.totalorder %s1327_s8, %s1052_s23  ;;  %s1130_s22 = smov [#allocation8]  }
  0x60   : > { %397 = vmatprep.subr.bf16.mxu0 %v932_v7  ;;  %v963_v33 = vld [vmem:[#allocation7] sm:$0xff]   ;;  %v293_v37 = vld [vmem:[%s1372_s2] sm:$0x3]  ;;  %s1056_s13 = sshll.u32 %s1130_s22, 4  ;;  %s1057_s13 = int_to_ptr.vmem [resolvable:$false] %s1056_s13 }
  0x61   : > { %v298_v39 = vrot.slane %v293_v37, %v297_v36  ;;  %v302_v40 = vrot.slane %v293_v37, %v301_v38  ;;  %p1054_p1 = pnand %p1053_p11, %p1393_p10  ;;  %s1058_s7 = scalar_lea.vmem %s1057_s13, 256 }
  0x62   : > { %830 = vmatpush3.bf16.msra.mxu1 %v951_v21  ;;  %p1059_p6 = scmp.lt.s32.totalorder %s1327_s8, %s1057_s13  ;;  %p1060_p12 = scmp.lt.s32.totalorder %s1058_s7, %s1052_s23 }
  0x63   : > { %398 = vmatpush1.bf16.msra.mxu0 %v934_v8  ;;  %831 = vmatprep.subr.bf16.mxu1 %v952_v22  ;;  %p1055_p2 = pneg %p1054_p1 }
  0x64   : > { %399 = vmatprep.subr.bf16.mxu0 %v935_v9  ;;  %p1061_p3 = por %p1060_p12, %p1059_p6 }
  0x66   : > { %832 = vmatpush3.bf16.msra.mxu1 %v953_v23  ;;  %p1062_p9 = pnand %p1061_p3, %p1055_p2 }
  0x67   : > { %400 = vmatpush1.bf16.msra.mxu0 %v937_v10  ;;  %833 = vmatprep.subr.bf16.mxu1 %v954_v24 }
  0x68   : > { %401 = vmatprep.subr.bf16.mxu0 %v938_v11 }
  0x6a   : > { %834 = vmatpush3.bf16.msra.mxu1 %v955_v25 }
  0x6b   : > { %402 = vmatpush1.bf16.msra.mxu0 %v940_v12  ;;  %835 = vmatprep.subr.bf16.mxu1 %v956_v26 }
  0x6c   : > { %403 = vmatprep.subr.bf16.mxu0 %v941_v13 }
  0x6e   : > { %836 = vmatpush3.bf16.msra.mxu1 %v957_v27  ;;  %v794_v27 = vld [vmem:[%s1374_s4] ss:$0 sm:$0xff] }
  0x6f   : > { %404 = vmatpush1.bf16.msra.mxu0 %v943_v14  ;;  %837 = vmatprep.subr.bf16.mxu1 %v958_v28 }
  0x70   : > { %405 = vmatprep.subr.bf16.mxu0 %v944_v15 }
  0x72   : > { %838 = vmatpush3.bf16.msra.mxu1 %v959_v29 }
  0x73   : > { %406 = vmatpush1.bf16.msra.mxu0 %v946_v16  ;;  %839 = vmatprep.subr.bf16.mxu1 %v960_v30 }
  0x76   : > { %424 = vmatmul.mubr.bf16.vlgmr.msra.gmra.mxu0 %v947_v17  ;;  %840 = vmatpush3.bf16.msra.mxu1 %v961_v31 }
  0x77   : > { %841 = vmatprep.subr.bf16.mxu1 %v962_v32 }
  0x7a   : > { %842 = vmatpush3.bf16.msra.mxu1 %v963_v33 }
 0x136   : > { %v425_v41 = vpop.f32.mrf.mxu0 }
 0x137   : > { %v426_v42 = vadd.f32 %v425_v41, %v298_v39 }
 0x138   : > { %v427_v43 = vpop.f32.mrf.mxu0 }
 0x139   : > { %v434_v44 = vmul.f32 %v426_v42, %v426_v42  ;;  %v428_v45 = vadd.f32 %v427_v43, %v302_v40 }
 0x13a   : > { %v429_v46 = vpop.f32.mrf.mxu0 }
 0x13b   : > { %v438_v47 = vmul.f32 %v434_v44, %v426_v42  ;;  %v435_v48 = vmul.f32 %v428_v45, %v428_v45  ;;  %v430_v49 = vadd.f32 %v429_v46, %v298_v39 }
 0x13c   : > { %v431_v50 = vpop.f32.mrf.mxu0 }
 0x13d   : > { %v442_v51 = vmul.f32 0.044715, %v438_v47  ;;  %v439_v52 = vmul.f32 %v435_v48, %v428_v45  ;;  %v436_v53 = vmul.f32 %v430_v49, %v430_v49  ;;  %v432_v54 = vadd.f32 %v431_v50, %v302_v40 }
 0x13f   : > { %v446_v55 = vadd.f32 %v442_v51, %v426_v42  ;;  %v443_v56 = vmul.f32 0.044715, %v439_v52  ;;  %v440_v57 = vmul.f32 %v436_v53, %v430_v49  ;;  %v437_v58 = vmul.f32 %v432_v54, %v432_v54 }
 0x141   : > { %v450_v59 = vmul.f32 0.7978846, %v446_v55  ;;  %v447_v60 = vadd.f32 %v443_v56, %v428_v45  ;;  %v444_v61 = vmul.f32 0.044715, %v440_v57  ;;  %v441_v62 = vmul.f32 %v437_v58, %v432_v54 }
 0x143   : > { %v448_v63 = vadd.f32 %v444_v61, %v430_v49  ;;  %v445_v0 = vmul.f32 0.044715, %v441_v62  ;;  %v451_v1 = vmul.f32 0.7978846, %v447_v60  ;;  %964 = vtanh.f32 %v450_v59 }
 0x145   : > { %v452_v2 = vmul.f32 0.7978846, %v448_v63  ;;  %v449_v3 = vadd.f32 %v445_v0, %v432_v54  ;;  %966 = vtanh.f32 %v451_v1 }
 0x147   : > { %968 = vtanh.f32 %v452_v2  ;;  %v453_v4 = vmul.f32 0.7978846, %v449_v3 }
 0x149   : > { %970 = vtanh.f32 %v453_v4 }
 0x150   : > { %v965_v5 = vpop.eup %964 }
 0x151   : > { %v458_v9 = vadd.f32 1.0, %v965_v5 }
 0x152   : > { %v967_v6 = vpop.eup %966 }
 0x153   : > { %v459_v7 = vadd.f32 1.0, %v967_v6  ;;  %v462_v15 = vmul.f32 0.5, %v458_v9 }
 0x154   : > { %v969_v8 = vpop.eup %968 }
 0x155   : > { %v460_v10 = vadd.f32 1.0, %v969_v8  ;;  %v463_v13 = vmul.f32 0.5, %v459_v7  ;;  %v466_v20 = vmul.f32 %v462_v15, %v426_v42 }
 0x156   : > { %v971_v11 = vpop.eup %970 }
 0x157   : > { %v461_v12 = vadd.f32 1.0, %v971_v11  ;;  %v464_v14 = vmul.f32 0.5, %v460_v10  ;;  %v467_v18 = vmul.f32 %v463_v13, %v428_v45 }
 0x159   : > { %v465_v16 = vmul.f32 0.5, %v461_v12  ;;  %v468_v17 = vmul.f32 %v464_v14, %v430_v49 }
 0x15b   : > { %v469_v19 = vmul.f32 %v465_v16, %v432_v54  ;;  %v470_v22 = vpack.c.bf16 %v468_v17, %v466_v20 }
 0x15d   : > { %v471_v21 = vpack.c.bf16 %v469_v19, %v467_v18 }
 0x15f   : > { %639 = vmatprep.mubr.bf16.mxu1 %v471_v21 }
 0x160   : > { %640 = vmatmul.mubr.bf16.vlgmr.msra.gmra.mxu1 %v470_v22 }
 0x220   : > { %v843_v23 = vpop.f32.mrf.mxu1 }
 0x222   : > { %v844_v24 = vpop.f32.mrf.mxu1 }
 0x223   : > { %v845_v26 = vadd.f32 %v844_v24, %v843_v23 }
 0x224   : > { %v846_v25 = vpop.f32.mrf.mxu1 }
 0x225   : > { %v642_v30 = vadd.f32 %v845_v26, %v794_v27 }
 0x226   : > { %v847_v28 = vpop.f32.mrf.mxu1 }
 0x227   : > { %v848_v29 = vadd.f32 %v847_v28, %v846_v25 }
 0x229   : > { %v645_v31 = vadd.f32 %v848_v29, %v794_v27 }
 0x22b   : > { %v825_v32 = vpack.c.bf16 %v645_v31, %v642_v30 }
 0x22d   : > { %826 = vst [vmem:[%s271_s16] sm:$0xff] %v825_v32  }
 0x22e   : > { %1065 = shalt.err (!%p1062_p9)
}
 0x22f   : > { %s1066_s15 = scalar_lea.hbm %s1325_s11, 128  ;;  %s1070_s14 = scalar_lea.hbm %s1375_s5, 256 }
 0x230   : > { %p1067_p13 = scmp.ne.s32.totalorder %s1325_s11, %s1066_s15  ;;  %p1071_p4 = scmp.lt.s32.totalorder %s1325_s11, %s1375_s5 }
 0x231   : > { %p1072_p8 = scmp.lt.s32.totalorder %s1070_s14, %s1066_s15 }
 0x232   : > { %p1068_p5 = pnand %p1067_p13, %p1393_p10 }
 0x233   : > { %p1073_p7 = por %p1072_p8, %p1071_p4 }
 0x234   : > { %p1069_p0 = pneg %p1068_p5 }
 0x236   : > { %p1074_p11 = pnand %p1073_p7, %p1069_p0 }
 0x238   : > { %1077 = shalt.err (!%p1074_p11)
}
 0x239   : > { %s1131_s16 = smov 64   ;;  %s1132_s9 = smov 4  }
 0x23a   : > { %859 = dma.vmem_to_hbm [thread:$0]  (%p1393_p10), %s1327_s8, 128, %s1325_s11, %s659_s27, %s1131_s16, %s1131_s16, %s1132_s9  }
 0x23b PF: > { %s687_s30 = sand.u32 1, %s1108_s18   ;;  %p1394_p1 = scmp.ne.s32.totalorder %s1382_s25, 0 }
 0x23c   : > { %p1395_p2 = scmp.ge.s32.totalorder %s1120_s21, 2  ;;  %s688_s23 = scalar_lea.sflag [#allocation4], %s687_s30 }
 0x23e   : > { %p873_p6 = pnand %p1395_p2, %p1394_p1 }
 0x240   : > { %p874_p12 = pneg %p873_p6 }
 0x242   : > { %1103 = dma.done.wait (%p874_p12), %s688_s23, 128  }
 0x243   : > { %1105 = vsyncadd (%p874_p12), %s688_s23, 4294967168  ;;  %p19_p3 = scmp.ge.s32.totalorder %s1238_s17, 4   ;;  %s1396_s18 = smov %s1112_s19 }
 0x244   : > { %s1397_s19 = smov %s1116_s20  ;;  %s1398_s20 = smov %s1247_s28 }
 0x245   : > { %s1399_s21 = smov %s1238_s17  ;;  %21 = sbr.rel (!%p19_p3) target bundleno = 6 (0x6), region = 93 }
 0x24a   :  { %693 = vsyncpa [#allocation3], 1 }
 0x24b   :  { %695 = vsyncpa [#allocation3 + $0x1], 1 }
 0x24c   :  { %696 = vsyncpa [#allocation6], 1 }
 0x24d   :  { %697 = vsyncpa [#allocation4], 1 }
 0x24e   :  { %699 = vsyncpa [#allocation4 + $0x1], 1 }

</bundles_post_ra>
